<compile_context>
chip_gen: v5e
topology: v5e:2x2
jax: 0.10.0
libtpu: 0.0.40
codegen_flags: <defaults>
</compile_context>

<pallas_src>
import functools

import jax
import jax.numpy as jnp
from jax.experimental import pallas as pl
from jax.experimental.pallas import tpu as pltpu


# ---------------------------------------------------------------------------
# Hardware introspection (generation-aware budgets / bf16-VPU capability).
# ---------------------------------------------------------------------------
def _device_kind():
    try:
        return jax.devices()[0].device_kind.lower()
    except Exception:
        return ""


def _vmem_capacity_bytes(kind):
    try:
        return int(pltpu.get_tpu_info().vmem_capacity_bytes)
    except Exception:
        # v7x has 64 MiB per TensorCore; v5e/v6e have 128 MiB.
        return (64 << 20) if "v7" in kind else (128 << 20)


# ---------------------------------------------------------------------------
# Fused path: pool + MLPs + branch softmax + weighted sum, one batch / step.
# ---------------------------------------------------------------------------
def _skconv3_fused_kernel(x_ref, blur_ref, w1x_ref, w2x_ref, w1b_ref, w2b_ref,
                          out_ref, *, use_mxu, bf16_scale):
    hw = x_ref.shape[-1]
    inv_hw = 1.0 / float(hw)

    # AdaptiveAvgPool2d(1): lane reduce over the spatial axis, f32 accumulation.
    pooled_x = jnp.sum(x_ref[...].astype(jnp.float32), axis=-1) * inv_hw  # (1, c)
    pooled_b = jnp.sum(blur_ref[...].astype(jnp.float32), axis=-1) * inv_hw

    def mlp(p, w1, w2):
        # p: (1, c), w1: (hid, c), w2: (c, hid); y = relu(p @ w1.T) @ w2.T
        if use_mxu:
            h = jax.lax.dot_general(p, w1.astype(jnp.float32),
                                    (((1,), (1,)), ((), ())),
                                    preferred_element_type=jnp.float32)
            h = jnp.maximum(h, 0.0)
            y = jax.lax.dot_general(h, w2.astype(jnp.float32),
                                    (((1,), (1,)), ((), ())),
                                    preferred_element_type=jnp.float32)
        else:
            # Tiny channel counts: broadcast-multiply + lane reduce avoids a
            # heavily padded matmul.
            h = jnp.sum(p[:, None, :] * w1[None, :, :].astype(jnp.float32), axis=-1)
            h = jnp.maximum(h, 0.0)
            y = jnp.sum(h[:, None, :] * w2[None, :, :].astype(jnp.float32), axis=-1)
        return y

    y_x = mlp(pooled_x, w1x_ref[...], w2x_ref[...])   # fc  branch, (1, c)
    y_b = mlp(pooled_b, w1b_ref[...], w2b_ref[...])   # fc2 branch, (1, c)

    # Softmax over the 2 branches (PyTorch softmax(dim=1) of (b, 2, c, 1, 1)).
    m = jnp.maximum(y_x, y_b)
    ex = jnp.exp(y_x - m)
    eb = jnp.exp(y_b - m)
    inv_denom = 1.0 / (ex + eb)
    a_x = (ex * inv_denom)[:, :, None]   # (1, c, 1)
    a_b = (eb * inv_denom)[:, :, None]

    # Re-read x/blur from VMEM for the final scale (bounds vreg live ranges).
    if bf16_scale:
        # bf16-capable VPU (v6e/v7x) and bf16 input: keep the scale in bf16,
        # halving vld/vst pressure and removing the largest f32 temporaries.
        out_ref[...] = (x_ref[...] * a_x.astype(out_ref.dtype)
                        + blur_ref[...] * a_b.astype(out_ref.dtype))
    else:
        out_ref[...] = (x_ref[...].astype(jnp.float32) * a_x
                        + blur_ref[...].astype(jnp.float32) * a_b
                        ).astype(out_ref.dtype)


# ---------------------------------------------------------------------------
# Two-pass fallback: lane-dense scale-and-add kernel over (b, c_tiles, hw_tiles).
# ---------------------------------------------------------------------------
def _skconv3_scale_kernel(ax_ref, ab_ref, x_ref, blur_ref, out_ref, *, bf16_scale):
    # ax/ab blocks are (1, tc, 1): layout-natural broadcast across the hw lanes.
    if bf16_scale:
        out_ref[...] = (x_ref[...] * ax_ref[...].astype(out_ref.dtype)
                        + blur_ref[...] * ab_ref[...].astype(out_ref.dtype))
    else:
        out_ref[...] = (x_ref[...].astype(jnp.float32) * ax_ref[...]
                        + blur_ref[...].astype(jnp.float32) * ab_ref[...]
                        ).astype(out_ref.dtype)


def _choose_scale_tiles(c, hw, itemsize, budget_bytes):
    """Pick (tc, tile_hw) so that 3 double-buffered (1,tc,tile_hw) slabs fit the
    budget while keeping tiles lane-dense (>=512 lanes when possible) and
    respecting the (8,128)/full-dim BlockSpec divisibility rule."""
    elems = max(budget_bytes // (6 * itemsize), 8 * 128)
    if c * hw <= elems:
        return c, hw                                # whole per-batch slab fits
    # Prefer keeping the full channel extent and tiling only hw (lane axis).
    t_hw = (elems // c) // 128 * 128
    if t_hw >= 512 or c % 8 != 0 or c <= 8:
        t_hw = max(t_hw, 128)
        t_hw = min(t_hw, hw)                        # == hw (full) or mult of 128
        return c, t_hw
    # Large c: tile channels too so the hw tile stays at the >=512-lane sweet spot.
    t_hw = min(hw, max(512, t_hw))
    if t_hw < hw:
        t_hw = max(t_hw // 128 * 128, 128)
    t_c = (elems // max(t_hw, 1)) // 8 * 8
    t_c = max(8, min(t_c, c))
    return t_c, t_hw


def skconv3(x, blur, w1x, w2x, w1b, w2b, *, force_two_pass=False):
    b, c, h, w = x.shape
    hw = h * w
    hid = w1x.shape[0]
    itemsize = jnp.dtype(x.dtype).itemsize

    kind = _device_kind()
    is_v7 = "v7" in kind
    bf16_vpu = ("v6" in kind) or ("v7" in kind)
    bf16_scale = bool(bf16_vpu and x.dtype == jnp.bfloat16)

    vmem_cap = _vmem_capacity_bytes(kind)
    fused_cap = vmem_cap - (16 << 20)       # headroom for Mosaic internals / retile
    scale_budget = max(16 << 20, vmem_cap // 4)

    x3 = x.reshape(b, c, hw)
    blur3 = blur.reshape(b, c, hw)

    slab_bytes = c * hw * itemsize                                   # one (1,c,hw) block
    weight_bytes = 4 * hid * c * jnp.dtype(w1x.dtype).itemsize
    # f32 upcast temporaries of the full slab (pool / non-bf16 scale) for narrow dtypes.
    upcast_bytes = (2 * c * hw * 4) if itemsize < 4 else 0
    # 3 slab-sized arrays (x, blur, out), double-buffered, plus weights + headroom.
    est_fused_vmem = 6 * slab_bytes + upcast_bytes + 2 * weight_bytes + (4 << 20)

    # v7x: grid=(b,) can only shard whole batches over the 2 TensorCores; with
    # b == 1 and a non-trivial slab the tiled two-pass path uses both cores.
    prefer_two_pass = is_v7 and b == 1 and slab_bytes >= (1 << 21)

    if not force_two_pass and not prefer_two_pass and est_fused_vmem <= fused_cap:
        # Always set the scoped VMEM limit explicitly (v5e's default is 16 MiB).
        fused_vmem_limit = int(min(max(est_fused_vmem, 24 << 20), fused_cap))
        cost = pl.CostEstimate(
            flops=6 * b * c * hw + 8 * b * c * hid,
            transcendentals=2 * b * c,
            bytes_accessed=3 * b * c * hw * itemsize + weight_bytes,
        )
        out = pl.pallas_call(
            functools.partial(_skconv3_fused_kernel,
                              use_mxu=(c >= 128), bf16_scale=bf16_scale),
            out_shape=jax.ShapeDtypeStruct((b, c, hw), x.dtype),
            grid=(b,),
            in_specs=[
                pl.BlockSpec((1, c, hw), lambda i: (i, 0, 0)),
                pl.BlockSpec((1, c, hw), lambda i: (i, 0, 0)),
                pl.BlockSpec((hid, c), lambda i: (0, 0)),
                pl.BlockSpec((c, hid), lambda i: (0, 0)),
                pl.BlockSpec((hid, c), lambda i: (0, 0)),
                pl.BlockSpec((c, hid), lambda i: (0, 0)),
            ],
            out_specs=pl.BlockSpec((1, c, hw), lambda i: (i, 0, 0)),
            compiler_params=pltpu.CompilerParams(
                dimension_semantics=("parallel",),
                vmem_limit_bytes=fused_vmem_limit,
            ),
            cost_estimate=cost,
        )(x3, blur3, w1x, w2x, w1b, w2b)
        return out.reshape(b, c, h, w)

    # --------- Two-pass fallback (slab too big, or b==1 on v7x) -------------
    # Pool + tiny MLPs + 2-way softmax in plain XLA (negligible work), then a
    # Pallas scale-and-add kernel tiled over (b, c_tiles, hw_tiles).
    f32 = jnp.float32
    px = jnp.mean(x3.astype(f32), axis=-1)        # (b, c)
    pb = jnp.mean(blur3.astype(f32), axis=-1)
    yx = jnp.maximum(px @ w1x.T.astype(f32), 0.0) @ w2x.T.astype(f32)
    yb = jnp.maximum(pb @ w1b.T.astype(f32), 0.0) @ w2b.T.astype(f32)
    att = jax.nn.softmax(jnp.stack([yx, yb], axis=1), axis=1)        # (b, 2, c)
    a_x = att[:, 0, :].reshape(b, c, 1).astype(f32)
    a_b = att[:, 1, :].reshape(b, c, 1).astype(f32)

    tc, tile_hw = _choose_scale_tiles(c, hw, itemsize, scale_budget)
    n_c = pl.cdiv(c, tc)
    n_hw = pl.cdiv(hw, tile_hw)
    fallback_vmem_limit = int(min(scale_budget + (8 << 20), fused_cap))

    cost = pl.CostEstimate(
        flops=3 * b * c * hw,
        transcendentals=0,
        bytes_accessed=3 * b * c * hw * itemsize + 2 * b * c * 4,
    )
    # hw axis is innermost so the (1, tc, 1) attention block index is unchanged
    # across consecutive steps -> DMA'd once per (batch, c-tile).
    out = pl.pallas_call(
        functools.partial(_skconv3_scale_kernel, bf16_scale=bf16_scale),
        out_shape=jax.ShapeDtypeStruct((b, c, hw), x.dtype),
        grid=(b, n_c, n_hw),
        in_specs=[
            pl.BlockSpec((1, tc, 1), lambda i, jc, jhw: (i, jc, 0)),
            pl.BlockSpec((1, tc, 1), lambda i, jc, jhw: (i, jc, 0)),
            pl.BlockSpec((1, tc, tile_hw), lambda i, jc, jhw: (i, jc, jhw)),
            pl.BlockSpec((1, tc, tile_hw), lambda i, jc, jhw: (i, jc, jhw)),
        ],
        out_specs=pl.BlockSpec((1, tc, tile_hw), lambda i, jc, jhw: (i, jc, jhw)),
        compiler_params=pltpu.CompilerParams(
            dimension_semantics=("parallel", "parallel", "parallel"),
            vmem_limit_bytes=fallback_vmem_limit,
        ),
        cost_estimate=cost,
    )(a_x, a_b, x3, blur3)
    return out.reshape(b, c, h, w)


if __name__ == "__main__":
    key = jax.random.PRNGKey(0)
    kx, kb, k1, k2, k3, k4 = jax.random.split(key, 6)

    b, c, h, w = 2, 8, 16, 16      # channel=8, reduction=4 -> hidden=2
    reduction = 4
    hid = c // reduction

    x = jax.random.normal(kx, (b, c, h, w), jnp.float32)
    blur = jax.random.normal(kb, (b, c, h, w), jnp.float32)

    # Deterministic synthetic weights (PyTorch nn.Linear weight shapes, no bias).
    w1x = jax.random.normal(k1, (hid, c), jnp.float32) * 0.1   # fc[0].weight
    w2x = jax.random.normal(k2, (c, hid), jnp.float32) * 0.1   # fc[2].weight
    w1b = jax.random.normal(k3, (hid, c), jnp.float32) * 0.1   # fc2[0].weight
    w2b = jax.random.normal(k4, (c, hid), jnp.float32) * 0.1   # fc2[2].weight

    # Pure-JAX reference to verify semantics.
    def ref(x, blur):
        px = jnp.mean(x, axis=(2, 3))
        pb = jnp.mean(blur, axis=(2, 3))
        yx = jnp.maximum(px @ w1x.T, 0.0) @ w2x.T
        yb = jnp.maximum(pb @ w1b.T, 0.0) @ w2b.T
        att = jax.nn.softmax(jnp.stack([yx, yb], axis=1), axis=1)  # (b, 2, c)
        return x * att[:, 0, :, None, None] + blur * att[:, 1, :, None, None]

    expected = ref(x, blur)

    # Primary fused path (grid over batch).
    out_fused = jax.block_until_ready(skconv3(x, blur, w1x, w2x, w1b, w2b))
    assert out_fused.shape == (b, c, h, w)
    assert jnp.allclose(out_fused, expected, atol=1e-5, rtol=1e-5), "fused path mismatch"

    # Exercise the tiled two-pass fallback on the same inputs.
    out_two = jax.block_until_ready(
        skconv3(x, blur, w1x, w2x, w1b, w2b, force_two_pass=True))
    assert jnp.allclose(out_two, expected, atol=1e-5, rtol=1e-5), "two-pass path mismatch"

    print("KERNEL_OK")
</pallas_src>

<mosaic_0001>
module attributes {stable_mosaic.version = 11 : i64} {
  func.func @_skconv3_fused_kernel(%arg0: i32, %arg1: memref<1x8x256xf32, #tpu.memory_space<vmem>>, %arg2: memref<1x8x256xf32, #tpu.memory_space<vmem>>, %arg3: memref<2x8xf32, #tpu.memory_space<vmem>>, %arg4: memref<8x2xf32, #tpu.memory_space<vmem>>, %arg5: memref<2x8xf32, #tpu.memory_space<vmem>>, %arg6: memref<8x2xf32, #tpu.memory_space<vmem>>, %arg7: memref<1x8x256xf32, #tpu.memory_space<vmem>>) attributes {dimension_semantics = [#tpu.dimension_semantics<parallel>], iteration_bounds = array<i64: 2>, scalar_prefetch = 0 : i64, scratch_operands = 0 : i64, tpu.core_type = #tpu.core_type<tc>, window_params = [{transform_indices = @transform_0, window_bounds = array<i64: 1, 8, 256>}, {transform_indices = @transform_1, window_bounds = array<i64: 1, 8, 256>}, {pipeline_mode = #tpu.pipeline_mode<synchronous>, transform_indices = @transform_2, window_bounds = array<i64: 2, 8>}, {pipeline_mode = #tpu.pipeline_mode<synchronous>, transform_indices = @transform_3, window_bounds = array<i64: 8, 2>}, {pipeline_mode = #tpu.pipeline_mode<synchronous>, transform_indices = @transform_4, window_bounds = array<i64: 2, 8>}, {pipeline_mode = #tpu.pipeline_mode<synchronous>, transform_indices = @transform_5, window_bounds = array<i64: 8, 2>}, {transform_indices = @transform_6, window_bounds = array<i64: 1, 8, 256>}]} {
    %c0 = arith.constant 0 : index
    %c0_0 = arith.constant 0 : index
    %c0_1 = arith.constant 0 : index
    %0 = vector.load %arg1[%c0, %c0_0, %c0_1] : memref<1x8x256xf32, #tpu.memory_space<vmem>>, vector<1x8x256xf32>
    %cst = arith.constant dense<0.000000e+00> : vector<1x8xf32>
    %1 = vector.multi_reduction <add>, %0, %cst [2] : vector<1x8x256xf32> to vector<1x8xf32>
    %cst_2 = arith.constant 3.906250e-03 : f32
    %2 = vector.broadcast %cst_2 : f32 to vector<1x8xf32>
    %3 = arith.mulf %1, %2 : vector<1x8xf32>
    %c0_3 = arith.constant 0 : index
    %c0_4 = arith.constant 0 : index
    %c0_5 = arith.constant 0 : index
    %4 = vector.load %arg2[%c0_3, %c0_4, %c0_5] : memref<1x8x256xf32, #tpu.memory_space<vmem>>, vector<1x8x256xf32>
    %cst_6 = arith.constant dense<0.000000e+00> : vector<1x8xf32>
    %5 = vector.multi_reduction <add>, %4, %cst_6 [2] : vector<1x8x256xf32> to vector<1x8xf32>
    %cst_7 = arith.constant 3.906250e-03 : f32
    %6 = vector.broadcast %cst_7 : f32 to vector<1x8xf32>
    %7 = arith.mulf %5, %6 : vector<1x8xf32>
    %c0_8 = arith.constant 0 : index
    %c0_9 = arith.constant 0 : index
    %8 = vector.load %arg3[%c0_8, %c0_9] : memref<2x8xf32, #tpu.memory_space<vmem>>, vector<2x8xf32>
    %c0_10 = arith.constant 0 : index
    %c0_11 = arith.constant 0 : index
    %9 = vector.load %arg4[%c0_10, %c0_11] : memref<8x2xf32, #tpu.memory_space<vmem>>, vector<8x2xf32>
    %10 = vector.shape_cast %3 : vector<1x8xf32> to vector<1x1x8xf32>
    %11 = vector.shape_cast %8 : vector<2x8xf32> to vector<1x2x8xf32>
    %12 = vector.broadcast %10 : vector<1x1x8xf32> to vector<1x2x8xf32>
    %13 = arith.mulf %12, %11 : vector<1x2x8xf32>
    %cst_12 = arith.constant dense<0.000000e+00> : vector<1x2xf32>
    %14 = vector.multi_reduction <add>, %13, %cst_12 [2] : vector<1x2x8xf32> to vector<1x2xf32>
    %cst_13 = arith.constant 0.000000e+00 : f32
    %15 = vector.broadcast %cst_13 : f32 to vector<1x2xf32>
    %16 = arith.maximumf %14, %15 : vector<1x2xf32>
    %17 = vector.shape_cast %16 : vector<1x2xf32> to vector<1x1x2xf32>
    %18 = vector.shape_cast %9 : vector<8x2xf32> to vector<1x8x2xf32>
    %19 = vector.broadcast %17 : vector<1x1x2xf32> to vector<1x8x2xf32>
    %20 = arith.mulf %19, %18 : vector<1x8x2xf32>
    %cst_14 = arith.constant dense<0.000000e+00> : vector<1x8xf32>
    %21 = vector.multi_reduction <add>, %20, %cst_14 [2] : vector<1x8x2xf32> to vector<1x8xf32>
    %c0_15 = arith.constant 0 : index
    %c0_16 = arith.constant 0 : index
    %22 = vector.load %arg5[%c0_15, %c0_16] : memref<2x8xf32, #tpu.memory_space<vmem>>, vector<2x8xf32>
    %c0_17 = arith.constant 0 : index
    %c0_18 = arith.constant 0 : index
    %23 = vector.load %arg6[%c0_17, %c0_18] : memref<8x2xf32, #tpu.memory_space<vmem>>, vector<8x2xf32>
    %24 = vector.shape_cast %7 : vector<1x8xf32> to vector<1x1x8xf32>
    %25 = vector.shape_cast %22 : vector<2x8xf32> to vector<1x2x8xf32>
    %26 = vector.broadcast %24 : vector<1x1x8xf32> to vector<1x2x8xf32>
    %27 = arith.mulf %26, %25 : vector<1x2x8xf32>
    %cst_19 = arith.constant dense<0.000000e+00> : vector<1x2xf32>
    %28 = vector.multi_reduction <add>, %27, %cst_19 [2] : vector<1x2x8xf32> to vector<1x2xf32>
    %cst_20 = arith.constant 0.000000e+00 : f32
    %29 = vector.broadcast %cst_20 : f32 to vector<1x2xf32>
    %30 = arith.maximumf %28, %29 : vector<1x2xf32>
    %31 = vector.shape_cast %30 : vector<1x2xf32> to vector<1x1x2xf32>
    %32 = vector.shape_cast %23 : vector<8x2xf32> to vector<1x8x2xf32>
    %33 = vector.broadcast %31 : vector<1x1x2xf32> to vector<1x8x2xf32>
    %34 = arith.mulf %33, %32 : vector<1x8x2xf32>
    %cst_21 = arith.constant dense<0.000000e+00> : vector<1x8xf32>
    %35 = vector.multi_reduction <add>, %34, %cst_21 [2] : vector<1x8x2xf32> to vector<1x8xf32>
    %36 = arith.maximumf %21, %35 : vector<1x8xf32>
    %37 = arith.subf %21, %36 : vector<1x8xf32>
    %38 = math.exp %37 : vector<1x8xf32>
    %39 = arith.subf %35, %36 : vector<1x8xf32>
    %40 = math.exp %39 : vector<1x8xf32>
    %41 = arith.addf %38, %40 : vector<1x8xf32>
    %cst_22 = arith.constant 1.000000e+00 : f32
    %42 = vector.broadcast %cst_22 : f32 to vector<1x8xf32>
    %43 = arith.divf %42, %41 : vector<1x8xf32>
    %44 = arith.mulf %38, %43 : vector<1x8xf32>
    %45 = vector.shape_cast %44 : vector<1x8xf32> to vector<1x8x1xf32>
    %46 = arith.mulf %40, %43 : vector<1x8xf32>
    %47 = vector.shape_cast %46 : vector<1x8xf32> to vector<1x8x1xf32>
    %c0_23 = arith.constant 0 : index
    %c0_24 = arith.constant 0 : index
    %c0_25 = arith.constant 0 : index
    %48 = vector.load %arg1[%c0_23, %c0_24, %c0_25] : memref<1x8x256xf32, #tpu.memory_space<vmem>>, vector<1x8x256xf32>
    %49 = vector.broadcast %45 : vector<1x8x1xf32> to vector<1x8x256xf32>
    %50 = arith.mulf %48, %49 : vector<1x8x256xf32>
    %c0_26 = arith.constant 0 : index
    %c0_27 = arith.constant 0 : index
    %c0_28 = arith.constant 0 : index
    %51 = vector.load %arg2[%c0_26, %c0_27, %c0_28] : memref<1x8x256xf32, #tpu.memory_space<vmem>>, vector<1x8x256xf32>
    %52 = vector.broadcast %47 : vector<1x8x1xf32> to vector<1x8x256xf32>
    %53 = arith.mulf %51, %52 : vector<1x8x256xf32>
    %54 = arith.addf %50, %53 : vector<1x8x256xf32>
    %c0_29 = arith.constant 0 : index
    %c0_30 = arith.constant 0 : index
    %c0_31 = arith.constant 0 : index
    %55 = vector.load %arg7[%c0_29, %c0_30, %c0_31] : memref<1x8x256xf32, #tpu.memory_space<vmem>>, vector<1x8x256xf32>
    tpu.vector_store %arg7[%c0_29, %c0_30, %c0_31], %54 {strides = array<i32>} : memref<1x8x256xf32, #tpu.memory_space<vmem>>, vector<1x8x256xf32>,
    return
  }
  func.func @transform_0(%arg0: i32) -> (i32, i32, i32) {
    %c0_i32 = arith.constant 0 : i32
    %c0_i32_0 = arith.constant 0 : i32
    %c0_i32_1 = arith.constant 0 : i32
    return %arg0, %c0_i32, %c0_i32_0 : i32, i32, i32
  }
  func.func @transform_1(%arg0: i32) -> (i32, i32, i32) {
    %c0_i32 = arith.constant 0 : i32
    %c0_i32_0 = arith.constant 0 : i32
    %c0_i32_1 = arith.constant 0 : i32
    return %arg0, %c0_i32, %c0_i32_0 : i32, i32, i32
  }
  func.func @transform_2(%arg0: i32) -> (i32, i32) {
    %c0_i32 = arith.constant 0 : i32
    %c0_i32_0 = arith.constant 0 : i32
    %c0_i32_1 = arith.constant 0 : i32
    return %c0_i32, %c0_i32_0 : i32, i32
  }
  func.func @transform_3(%arg0: i32) -> (i32, i32) {
    %c0_i32 = arith.constant 0 : i32
    %c0_i32_0 = arith.constant 0 : i32
    %c0_i32_1 = arith.constant 0 : i32
    return %c0_i32, %c0_i32_0 : i32, i32
  }
  func.func @transform_4(%arg0: i32) -> (i32, i32) {
    %c0_i32 = arith.constant 0 : i32
    %c0_i32_0 = arith.constant 0 : i32
    %c0_i32_1 = arith.constant 0 : i32
    return %c0_i32, %c0_i32_0 : i32, i32
  }
  func.func @transform_5(%arg0: i32) -> (i32, i32) {
    %c0_i32 = arith.constant 0 : i32
    %c0_i32_0 = arith.constant 0 : i32
    %c0_i32_1 = arith.constant 0 : i32
    return %c0_i32, %c0_i32_0 : i32, i32
  }
  func.func @transform_6(%arg0: i32) -> (i32, i32, i32) {
    %c0_i32 = arith.constant 0 : i32
    %c0_i32_0 = arith.constant 0 : i32
    %c0_i32_1 = arith.constant 0 : i32
    return %arg0, %c0_i32, %c0_i32_0 : i32, i32, i32
  }
}

</mosaic_0001>

<bundles_post_ra>
// kernel: tpu_custom_call.1
= control target key start
LH: loop header
LB: loop body
LE: loop exit
PB: predicated region body
PF: predicated region fallthrough
CT: control target
= control target key end

     0   :  { %s1293_s0 = inlined_call_operand.hbm [shape: f32[2,8,256], index: 0, kind: input, shape index: {}]   ;;  %s1294_s1 = inlined_call_operand.hbm [shape: f32[2,8,256], index: 1, kind: input, shape index: {}]   ;;  %s1295_s2 = inlined_call_operand.vmem [shape: f32[2,8], index: 2, kind: input, shape index: {}]   ;;  %s1296_s3 = inlined_call_operand.vmem [shape: f32[8,2], index: 3, kind: input, shape index: {}]   ;;  %s1297_s4 = inlined_call_operand.vmem [shape: f32[2,8], index: 4, kind: input, shape index: {}]   ;;  %s1298_s5 = inlined_call_operand.vmem [shape: f32[8,2], index: 5, kind: input, shape index: {}]   ;;  %s1299_s6 = inlined_call_operand.hbm [shape: f32[2,8,256], index: 6, kind: output, shape index: {}]  }
   0x1   :  { %1301 = sst [smem:[#allocation13_spill]] %s1293_s0 }
   0x2   :  { %11 = vsyncpa [#allocation3], 0 }
   0x3   :  { %13 = vsyncpa [#allocation3 + $0x1], 0 }
   0x4   :  { %14 = vsyncpa [#allocation6], 0 }
   0x5   :  { %16 = vsyncpa [#allocation6 + $0x1], 0 }
   0x6   :  { %17 = vsyncpa [#allocation4], 0 }
   0x7   :  { %19 = vsyncpa [#allocation4 + $0x1], 0  ;;  %s1053_s21 = smov 0   ;;  %s1055_s22 = smov 0  }
   0x8   :  { %s1057_s23 = smov 0   ;;  %s1059_s24 = smov 0  }
   0x9 LB: > { %1302 = sst [smem:[#allocation11_spill]] %s1011_s23  ;;  %s1074_s25 = sadd.s32 4294967295, %s1015_s24   ;;  %s1015_s24 = sphi %s1059_s24, %s1316_s24   ;;  %s1011_s23 = sphi %s1057_s23, %s1313_s23   ;;  %s1007_s22 = sphi %s1055_s22, %s1315_s22   ;;  %s1003_s21 = sphi %s1053_s21, %s1314_s21  }
   0xa   : > { %s798_s26 = sadd.s32 4294967294, %s1015_s24   ;;  %s1078_s27 = sadd.s32 1, %s1015_s24  }
   0xb   : > { %s32_s28 = sadd.s32 1, %s1011_s23  ;;  %s29_s29 = ssub.s32 %s1015_s24, %s1078_s27 }
   0xc   : > { %p39_p0 = scmp.ne.s32.totalorder %s1011_s23, %s1007_s22  ;;  %p30_p1 = scmp.eq.s32.totalorder %s29_s29, 0 }
   0xd   : > { %p40_p2 = scmp.eq.s32.totalorder %s1015_s24, 0  ;;  %p45_p3 = scmp.ne.s32.totalorder %s1007_s22, %s1003_s21 }
   0xe   : > { %p46_p4 = scmp.eq.s32.totalorder %s1074_s25, 0  ;;  %p179_p7 = scmp.eq.s32.totalorder %s1074_s25, 1 }
   0xf   : > { %s1090_s30 = scalar_select %p30_p1, %s1011_s23, %s32_s28  }
  0x10   : > { %p1092_p5 = por %p40_p2, %p39_p0  ;;  %p1096_p6 = por %p46_p4, %p45_p3 }
  0x11   : > { %1303 = sst [smem:[#allocation12_spill]] %s1090_s30  ;;  %p185_p8 = scmp.eq.s32.totalorder %s798_s26, 1 }
  0x12   : > { %p836_p10 = scmp.lt.s32.totalorder %s1015_s24, 2  ;;  %p1103_p11 = por %p179_p7, %p39_p0 }
  0x13   : > { %p1107_p12 = por %p185_p8, %p45_p3  ;;  %s1112_s11 = sand.u32 1, %s1011_s23  }
  0x14   : > { %s816_s12 = sshll.u32 %s1015_s24, 4  ;;  %s801_s13 = sshll.u32 %s1112_s11, 4 }
  0x15   : > { %s1308_s0 = sld [smem:[#allocation13_spill]]  ;;  %s221_s18 = scalar_lea.vmem [#allocation2], %s801_s13 }
  0x16   : > { %s230_s19 = sshll.u32 %s221_s18, 4  ;;  %p1121_p13 = pnand %p836_p10, %p1092_p5  ;;  %s231_s19 = int_to_ptr.vmem [resolvable:$true] %s230_s19 }
  0x17   : > { %p807_p0 = scmp.ge.s32.totalorder %s1015_s24, 1  ;;  %p255_p1 = scmp.lt.s32.totalorder %s1015_s24, 3 }
  0x18   : > { %s218_s26 = scalar_lea.sflag [#allocation3], %s1112_s11  ;;  %p889_p3 = pneg %p1121_p13 }
  0x1b   : > { %s226_s16 = scalar_lea.hbm %s1308_s0, %s816_s12  ;;  %s892_s15 = scalar_lea.hbm %s1308_s0, 32 }
  0x1c   : > { %s228_s17 = sshll.u32 %s226_s16, 4  ;;  %s229_s17 = int_to_ptr.hbm [resolvable:$true] %s228_s17 }
  0x1d   : > { %s885_s28 = sshra.s32 %s229_s17, 4  ;;  %s886_s28 = int_to_ptr.hbm [resolvable:$true] %s885_s28 }
  0x1e   : > { %s887_s29 = scalar_lea.hbm %s886_s28, 16  ;;  %p893_p5 = scmp.lt.s32.totalorder %s886_s28, %s1308_s0 }
  0x1f   : > { %p888_p2 = scmp.ne.s32.totalorder %s886_s28, %s887_s29  ;;  %p894_p8 = scmp.lt.s32.totalorder %s892_s15, %s887_s29 }
  0x21   : > { %p890_p4 = pnand %p889_p3, %p888_p2  ;;  %p895_p10 = por %p894_p8, %p893_p5 }
  0x23   : > { %p891_p7 = pneg %p890_p4 }
  0x25   : > { %p896_p9 = pnand %p895_p10, %p891_p7 }
  0x27   : > { %899 = shalt.err (!%p896_p9)
}
  0x28   : > { %828 = dma.hbm_to_vmem [thread:$0]  (!%p1121_p13), %s229_s17, 256, %s231_s19, %s218_s26  }
  0x29   : > { %p1145_p2 = pnand %p807_p0, %p255_p1  ;;  %s246_s28 = scalar_lea.hbm %s1294_s1, %s816_s12 }
  0x2a   : > { %s248_s29 = sshll.u32 %s246_s28, 4  ;;  %s241_s15 = scalar_lea.vmem [#allocation5], %s801_s13  ;;  %s249_s29 = int_to_ptr.hbm [resolvable:$true] %s248_s29 }
  0x2b   : > { %s250_s18 = sshll.u32 %s241_s15, 4  ;;  %s238_s0 = scalar_lea.sflag [#allocation6], %s1112_s11  ;;  %s251_s18 = int_to_ptr.vmem [resolvable:$true] %s250_s18 }
  0x2c   : > { %s915_s30 = sshra.s32 %s249_s29, 4  ;;  %s922_s26 = scalar_lea.hbm %s1294_s1, 32  ;;  %s916_s30 = int_to_ptr.hbm [resolvable:$true] %s915_s30 }
  0x2d   : > { %s917_s23 = scalar_lea.hbm %s916_s30, 16  ;;  %p923_p4 = scmp.lt.s32.totalorder %s916_s30, %s1294_s1 }
  0x2e   : > { %p918_p9 = scmp.ne.s32.totalorder %s916_s30, %s917_s23  ;;  %p924_p7 = scmp.lt.s32.totalorder %s922_s26, %s917_s23 }
  0x30   : > { %p920_p0 = pnand %p918_p9, %p889_p3  ;;  %p925_p5 = por %p924_p7, %p923_p4 }
  0x32   : > { %p921_p1 = pneg %p920_p0 }
  0x34   : > { %p926_p8 = pnand %p925_p5, %p921_p1 }
  0x36   : > { %929 = shalt.err (!%p926_p8)
}
  0x37   : > { %831 = dma.hbm_to_vmem [thread:$0]  (!%p1121_p13), %s249_s29, 256, %s251_s18, %s238_s0  }
  0x38   : > { %259 = sbr.rel (%p1145_p2) target bundleno = 744 (0x2e8), region = 44  ;;  %s1167_s11 = sand.u32 (!%p1145_p2), 1, %s1007_s22  }
  0x39   : > { %s1170_s13 = sshll.u32 (!%p1145_p2), %s1167_s11, 4  ;;  %s262_s30 = scalar_lea.sflag (!%p1145_p2), [#allocation3], %s1167_s11 }
  0x3a   : > { %s265_s23 = scalar_lea.vmem (!%p1145_p2), [#allocation2], %s1170_s13 }
  0x3d   : > { %990 = dma.done.wait (%p1096_p6), %s262_s30, 256  }
  0x3e   : > { %992 = vsyncadd (%p1096_p6), %s262_s30, 4294967040  ;;  %s272_s0 = scalar_lea.sflag [#allocation6], %s1167_s11  ;;  %s275_s20 = scalar_lea.vmem [#allocation5], %s1170_s13 }
  0x3f   : > { %994 = dma.done.wait (%p1096_p6), %s272_s0, 256  }
  0x40   : > { %996 = vsyncadd (%p1096_p6), %s272_s0, 4294967040  ;;  %v326_v0 = vlaneseq  ;;  %v1190_v2 = vld [vmem:[%s265_s23] sm:$0xff]  ;;  %v1192_v3 = vld [vmem:[%s265_s23 + $0x8] sm:$0xff]  ;;  %v1017_v22 = vmov 0   ;;  %vm355_vm0 = vcmask 1041409   ;;  %vm358_vm1 = vcmask 58368  }
  0x41   : > { %v322_v4 = vld [vmem:[%s1295_s2] sm:$0x3]  ;;  %v312_v5 = vadd.f32 %v1192_v3, %v1190_v2  ;;  %v1204_v10 = vld [vmem:[%s275_s20 + $0x8] sm:$0xff]  ;;  %vm477_vm2 = vcmask 1042434   ;;  %vm479_vm3 = vcmask 1043459   ;;  %vm481_vm4 = vcmask 1044484  }
  0x42   : > { %v1185_v1 = vshrl.u32 %v326_v0, 7  ;;  %v325_v6 = vperm.slane %v322_v4, 0  ;;  %v323_v7 = vld [vmem:[%s1296_s3] sm:$0xff]  ;;  %v332_v13 = vperm.slane %v322_v4, 1  ;;  %v1218_v50 = vand.u32 127, %v326_v0  ;;  %s818_s19 = sshll.u32 %s1074_s25, 4 }
  0x43   : > { %v371_v8 = vperm.slane %v323_v7, 1  ;;  %313 = vadd.xlane.f32.xlu0 %v312_v5  ;;  %v1202_v9 = vld [vmem:[%s275_s20] sm:$0xff]  ;;  %v364_v15 = vperm.slane %v323_v7, 0  ;;  %v392_v16 = vperm.slane %v323_v7, 4  ;;  %v406_v18 = vperm.slane %v323_v7, 6  ;;  %s700_s12 = scalar_lea.hbm %s1299_s6, %s818_s19  ;;  %s309_s25 = scalar_lea.vmem [#allocation7], %s1170_s13 }
  0x44   : > { %871 = vset.pattern.permute.xlu1 %v1185_v1  ;;  %872 = vset.pattern.permute.xlu2 %v1185_v1  ;;  %v494_v11 = vld [vmem:[%s1297_s4] sm:$0x3]  ;;  %v318_v12 = vadd.f32 %v1204_v10, %v1202_v9  ;;  %v385_v19 = vperm.slane %v323_v7, 3  ;;  %v399_v20 = vperm.slane %v323_v7, 5  ;;  %v413_v21 = vperm.slane %v323_v7, 7  ;;  %s702_s30 = sshll.u32 %s309_s25, 4  ;;  %s703_s30 = int_to_ptr.vmem [resolvable:$true] %s702_s30 }
  0x45   : > { %873 = vset.pattern.permute.xlu0 %v1185_v1  ;;  %v504_v14 = vperm.slane %v494_v11, 1  ;;  %v497_v17 = vperm.slane %v494_v11, 0  ;;  %v378_v23 = vperm.slane %v323_v7, 2  ;;  %v495_v24 = vld [vmem:[%s1298_s5] sm:$0xff]  ;;  %vm483_vm5 = vcmask 1045509   ;;  %s704_s23 = sshll.u32 %s700_s12, 4  ;;  %s705_s23 = int_to_ptr.hbm [resolvable:$true] %s704_s23 }
  0x46   : > { %v532_v25 = vperm.slane %v495_v24, 0  ;;  %v553_v26 = vperm.slane %v495_v24, 3  ;;  %v567_v29 = vperm.slane %v495_v24, 5  ;;  %v581_v34 = vperm.slane %v495_v24, 7  ;;  %s689_s0 = scalar_lea.sflag [#allocation4], %s1167_s11  ;;  %s959_s20 = sshra.s32 %s705_s23, 4  ;;  %s960_s20 = int_to_ptr.hbm [resolvable:$true] %s959_s20 }
  0x47   : > { %v539_v43 = vperm.slane %v495_v24, 1  ;;  %v546_v45 = vperm.slane %v495_v24, 2  ;;  %v560_v47 = vperm.slane %v495_v24, 4  ;;  %v574_v51 = vperm.slane %v495_v24, 6  ;;  %s961_s7 = scalar_lea.hbm %s960_s20, 16  ;;  %s965_s13 = scalar_lea.hbm %s1299_s6, 32 }
  0x48   : > { %vm485_vm6 = vcmask 1046534   ;;  %vm487_vm7 = vcmask 1047559   ;;  %vm490_vm8 = vcmask 15360   ;;  %p962_p6 = scmp.ne.s32.totalorder %s960_s20, %s961_s7  ;;  %p966_p10 = scmp.lt.s32.totalorder %s960_s20, %s1299_s6 }
  0x49   : > { %p967_p2 = scmp.lt.s32.totalorder %s965_s13, %s961_s7 }
  0x4a   : > { %p963_p13 = pnand %p962_p6, %p1103_p11 }
  0x4b   : > { %319 = vadd.xlane.f32.xlu0 %v318_v12  ;;  %p968_p9 = por %p967_p2, %p966_p10 }
  0x4c   : > { %330 = vperm.xlu1 %871, %v325_v6   ;;  %376 = vperm.xlu2 %872, %v371_v8   ;;  %p964_p3 = pneg %p963_p13 }
  0x4e   : > { %p969_p0 = pnand %p968_p9, %p964_p3 }
  0x54   : > { %337 = vperm.xlu1 %871, %v332_v13   ;;  %509 = vperm.xlu2 %872, %v504_v14  }
  0x5c   : > { %369 = vperm.xlu1 %871, %v364_v15   ;;  %397 = vperm.xlu2 %872, %v392_v16  }
  0x5f   : > { %383 = vperm.xlu0 %873, %v378_v23  }
  0x64   : > { %502 = vperm.xlu1 %871, %v497_v17   ;;  %411 = vperm.xlu2 %872, %v406_v18  }
  0x67   : > { %537 = vperm.xlu0 %873, %v532_v25  }
  0x6c   : > { %390 = vperm.xlu1 %871, %v385_v19   ;;  %874 = vset.pattern.permute.xlu2 %v1017_v22 }
  0x6f   : > { %558 = vperm.xlu0 %873, %v553_v26  }
  0x74   : > { %404 = vperm.xlu1 %871, %v399_v20  }
  0x77   : > { %572 = vperm.xlu0 %873, %v567_v29  }
  0x7c   : > { %418 = vperm.xlu1 %871, %v413_v21  }
  0x7f   : > { %586 = vperm.xlu0 %873, %v581_v34  }
  0x84   : > { %875 = vset.pattern.permute.xlu1 %v1017_v22 }
  0x87   : > { %877 = vset.pattern.permute.xlu0 %v1017_v22 }
  0xa6   : > { %v1214_v27 = vpop.permute.xlu2 %376 }
  0xae   : > { %v510_v37 = vpop.permute.xlu2 %509 }
  0xb6   : > { %v314_v28 = vpop.xlane.xlu0 %313  ;;  %v398_v44 = vpop.permute.xlu2 %397 }
  0xb7   : > { %v315_v30 = vmul.f32 0.00390625, %v314_v28 }
  0xbe   : > { %v331_v31 = vpop.permute.xlu1 %330  ;;  %v320_v33 = vpop.xlane.xlu0 %319 }
  0xbf   : > { %v341_v32 = vmul.f32 %v331_v31, %v315_v30  ;;  %v321_v35 = vmul.f32 0.00390625, %v320_v33  ;;  %v412_v46 = vpop.permute.xlu2 %411 }
  0xc1   : > { %346 = vperm.xlu2 %874, %v341_v32   ;;  %v514_v39 = vmul.f32 %v510_v37, %v321_v35 }
  0xc3   : > { %521 = vperm.xlu1 %875, %v514_v39  }
  0xc6   : > { %v338_v36 = vpop.permute.xlu1 %337 }
  0xc7   : > { %v342_v38 = vmul.f32 %v338_v36, %v315_v30 }
  0xc9   : > { %349 = vperm.xlu2 %874, %v342_v38  }
  0xcb   : > { %876 = vset.pattern.permute.xlu1 %v1185_v1 }
  0xce   : > { %v370_v40 = vpop.permute.xlu1 %369 }
  0xd1   : > { %v384_v1 = vpop.permute.xlu0 %383 }
  0xd3   : > { %544 = vperm.xlu1 %876, %v539_v43  }
  0xd6   : > { %v503_v41 = vpop.permute.xlu1 %502 }
  0xd7   : > { %v513_v42 = vmul.f32 %v503_v41, %v321_v35 }
  0xd9   : > { %518 = vperm.xlu2 %874, %v513_v42   ;;  %v538_v4 = vpop.permute.xlu0 %537 }
  0xdb   : > { %551 = vperm.xlu1 %876, %v546_v45  }
  0xde   : > { %v391_v49 = vpop.permute.xlu1 %390 }
  0xe1   : > { %v559_v5 = vpop.permute.xlu0 %558 }
  0xe3   : > { %565 = vperm.xlu1 %876, %v560_v47  }
  0xe6   : > { %v405_v57 = vpop.permute.xlu1 %404 }
  0xe9   : > { %v573_v6 = vpop.permute.xlu0 %572 }
  0xeb   : > { %579 = vperm.xlu1 %876, %v574_v51  }
  0xee   : > { %v419_v58 = vpop.permute.xlu1 %418 }
  0xf1   : > { %v587_v7 = vpop.permute.xlu0 %586 }
  0xf3   : > { %878 = vset.pattern.permute.xlu1 %v1017_v22 }
 0x11b   : > { %v347_v48 = vpop.permute.xlu2 %346 }
 0x11c   : > { %v353_v53 = vperm.slane %v347_v48, %v1218_v50 }
 0x123   : > { %v350_v52 = vpop.permute.xlu2 %349 }
 0x124   : > { %v354_v54 = vperm.slane %v350_v52, %v1218_v50 }
 0x126   : > { %v356_v55 = vsel %vm355_vm0, %v354_v54, %v353_v53 }
 0x127   : > { %v359_v56 = vsel %vm358_vm1, %v356_v55, 0.0 }
 0x128   : > { %360 = vadd.xlane.f32.xlu0 %v359_v56 }
 0x133   : > { %v519_v59 = vpop.permute.xlu2 %518 }
 0x134   : > { %v523_v61 = vperm.slane %v519_v59, %v1218_v50 }
 0x135   : > { %v522_v60 = vpop.permute.xlu1 %521 }
 0x136   : > { %v524_v62 = vperm.slane %v522_v60, %v1218_v50 }
 0x138   : > { %v525_v63 = vsel %vm355_vm0, %v524_v62, %v523_v61 }
 0x139   : > { %v527_v0 = vsel %vm358_vm1, %v525_v63, 0.0 }
 0x13a   : > { %528 = vadd.xlane.f32.xlu2 %v527_v0 }
 0x145   : > { %v545_v15 = vpop.permute.xlu1 %544 }
 0x14d   : > { %v552_v18 = vpop.permute.xlu1 %551 }
 0x155   : > { %v566_v24 = vpop.permute.xlu1 %565 }
 0x15d   : > { %v580_v28 = vpop.permute.xlu1 %579 }
 0x19b   : > { %v361_v8 = vpop.xlane.xlu0 %360 }
 0x19c   : > { %v362_v11 = vmax.f32 %v361_v8, 0.0 }
 0x19e   : > { %v430_v12 = vmul.f32 %v384_v1, %v362_v11  ;;  %v429_v13 = vmul.f32 %v1214_v27, %v362_v11  ;;  %v428_v14 = vmul.f32 %v370_v40, %v362_v11  ;;  %v432_v16 = vmul.f32 %v398_v44, %v362_v11 }
 0x19f   : > { %v431_v17 = vmul.f32 %v391_v49, %v362_v11  ;;  %v433_v26 = vmul.f32 %v405_v57, %v362_v11  ;;  %v434_v27 = vmul.f32 %v412_v46, %v362_v11  ;;  %v435_v33 = vmul.f32 %v419_v58, %v362_v11 }
 0x1a0   : > { %451 = vperm.xlu1 %878, %v430_v12   ;;  %448 = vperm.xlu0 %877, %v429_v13  }
 0x1a1   : > { %445 = vperm.xlu2 %874, %v428_v14  }
 0x1a8   : > { %457 = vperm.xlu1 %878, %v432_v16  }
 0x1a9   : > { %454 = vperm.xlu2 %874, %v431_v17  }
 0x1ad   : > { %v529_v19 = vpop.xlane.xlu2 %528 }
 0x1ae   : > { %v530_v20 = vmax.f32 %v529_v19, 0.0 }
 0x1b0   : > { %v596_v21 = vmul.f32 %v538_v4, %v530_v20  ;;  %v598_v22 = vmul.f32 %v552_v18, %v530_v20  ;;  %v597_v23 = vmul.f32 %v545_v15, %v530_v20  ;;  %v599_v25 = vmul.f32 %v559_v5, %v530_v20 }
 0x1b1   : > { %v602_v29 = vmul.f32 %v580_v28, %v530_v20  ;;  %v600_v30 = vmul.f32 %v566_v24, %v530_v20  ;;  %v603_v31 = vmul.f32 %v587_v7, %v530_v20  ;;  %v601_v32 = vmul.f32 %v573_v6, %v530_v20 }
 0x1b2   : > { %613 = vperm.xlu1 %878, %v596_v21   ;;  %619 = vperm.xlu0 %877, %v598_v22  }
 0x1b3   : > { %616 = vperm.xlu2 %874, %v597_v23  }
 0x1ba   : > { %622 = vperm.xlu1 %878, %v599_v25   ;;  %460 = vperm.xlu0 %877, %v433_v26  }
 0x1bb   : > { %463 = vperm.xlu2 %874, %v434_v27  }
 0x1c2   : > { %625 = vperm.xlu1 %878, %v600_v30   ;;  %631 = vperm.xlu0 %877, %v602_v29  }
 0x1c3   : > { %634 = vperm.xlu2 %874, %v603_v31  }
 0x1ca   : > { %628 = vperm.xlu1 %878, %v601_v32  }
 0x1d2   : > { %466 = vperm.xlu1 %878, %v435_v33  }
 0x1fb   : > { %v446_v35 = vpop.permute.xlu2 %445 }
 0x1fc   : > { %v468_v49 = vperm.slane %v446_v35, %v1218_v50 }
 0x203   : > { %v455_v38 = vpop.permute.xlu2 %454 }
 0x204   : > { %v471_v58 = vperm.slane %v455_v38, %v1218_v50 }
 0x20d   : > { %v617_v41 = vpop.permute.xlu2 %616 }
 0x20e   : > { %v637_v48 = vperm.slane %v617_v41, %v1218_v50 }
 0x212   : > { %v452_v34 = vpop.permute.xlu1 %451  ;;  %v449_v37 = vpop.permute.xlu0 %448 }
 0x213   : > { %v469_v47 = vperm.slane %v449_v37, %v1218_v50  ;;  %v470_v52 = vperm.slane %v452_v34, %v1218_v50 }
 0x215   : > { %v464_v44 = vpop.permute.xlu2 %463  ;;  %v476_v55 = vsel %vm355_vm0, %v469_v47, %v468_v49 }
 0x216   : > { %v478_v62 = vsel %vm477_vm2, %v470_v52, %v476_v55  ;;  %v474_v17 = vperm.slane %v464_v44, %v1218_v50 }
 0x217   : > { %v480_v12 = vsel %vm479_vm3, %v471_v58, %v478_v62 }
 0x21a   : > { %v458_v36 = vpop.permute.xlu1 %457 }
 0x21b   : > { %v472_v1 = vperm.slane %v458_v36, %v1218_v50 }
 0x21d   : > { %v635_v59 = vpop.permute.xlu2 %634  ;;  %v482_v14 = vsel %vm481_vm4, %v472_v1, %v480_v12 }
 0x21e   : > { %v643_v6 = vperm.slane %v635_v59, %v1218_v50 }
 0x224   : > { %v614_v39 = vpop.permute.xlu1 %613  ;;  %v620_v40 = vpop.permute.xlu0 %619 }
 0x225   : > { %v636_v46 = vperm.slane %v614_v39, %v1218_v50  ;;  %v638_v51 = vperm.slane %v620_v40, %v1218_v50 }
 0x227   : > { %v644_v53 = vsel %vm355_vm0, %v637_v48, %v636_v46 }
 0x228   : > { %v645_v60 = vsel %vm477_vm2, %v638_v51, %v644_v53 }
 0x22c   : > { %v623_v42 = vpop.permute.xlu1 %622  ;;  %v461_v43 = vpop.permute.xlu0 %460 }
 0x22d   : > { %v639_v54 = vperm.slane %v623_v42, %v1218_v50  ;;  %v473_v7 = vperm.slane %v461_v43, %v1218_v50 }
 0x22f   : > { %v646_v63 = vsel %vm479_vm3, %v639_v54, %v645_v60  ;;  %v484_v16 = vsel %vm483_vm5, %v473_v7, %v482_v14 }
 0x230   : > { %v486_v20 = vsel %vm485_vm6, %v474_v17, %v484_v16 }
 0x234   : > { %v626_v45 = vpop.permute.xlu1 %625  ;;  %v632_v57 = vpop.permute.xlu0 %631 }
 0x235   : > { %v640_v56 = vperm.slane %v626_v45, %v1218_v50  ;;  %v642_v5 = vperm.slane %v632_v57, %v1218_v50 }
 0x237   : > { %v647_v4 = vsel %vm481_vm4, %v640_v56, %v646_v63 }
 0x23c   : > { %v629_v61 = vpop.permute.xlu1 %628 }
 0x23d   : > { %v641_v0 = vperm.slane %v629_v61, %v1218_v50 }
 0x23f   : > { %v648_v8 = vsel %vm483_vm5, %v641_v0, %v647_v4 }
 0x240   : > { %v649_v11 = vsel %vm485_vm6, %v642_v5, %v648_v8 }
 0x241   : > { %v650_v13 = vsel %vm487_vm7, %v643_v6, %v649_v11 }
 0x242   : > { %v652_v15 = vsel %vm490_vm8, %v650_v13, 0.0 }
 0x243   : > { %653 = vadd.xlane.f32.xlu1 %v652_v15 }
 0x244   : > { %v467_v18 = vpop.permute.xlu1 %466 }
 0x245   : > { %v475_v19 = vperm.slane %v467_v18, %v1218_v50 }
 0x247   : > { %v488_v21 = vsel %vm487_vm7, %v475_v19, %v486_v20 }
 0x248   : > { %v491_v22 = vsel %vm490_vm8, %v488_v21, 0.0 }
 0x249   : > { %492 = vadd.xlane.f32.xlu0 %v491_v22 }
 0x2b6   : > { %v654_v23 = vpop.xlane.xlu1 %653 }
 0x2bc   : > { %v493_v24 = vpop.xlane.xlu0 %492 }
 0x2bd   : > { %v655_v25 = vmax.f32 %v493_v24, %v654_v23 }
 0x2bf   : > { %v656_v26 = vsub.f32 %v493_v24, %v655_v25  ;;  %v659_v27 = vsub.f32 %v654_v23, %v655_v25 }
 0x2c1   : > { %v657_v28 = vmul.f32 1.442695, %v656_v26  ;;  %v660_v29 = vmul.f32 1.442695, %v659_v27 }
 0x2c3   : > { %879 = vpow2.f32 %v657_v28 }
 0x2c4   : > { %881 = vpow2.f32 %v660_v29 }
 0x2c9   : > { %v880_v30 = vpop.eup %879 }
 0x2ca   : > { %v882_v31 = vpop.eup %881 }
 0x2cb   : > { %v662_v32 = vadd.f32 %v882_v31, %v880_v30 }
 0x2cd   : > { %883 = vrcp.f32 %v662_v32  ;;  %v674_v35 = vand.u32 2147483648, %v662_v32  ;;  %v672_v37 = vand.u32 2147483647, %v662_v32  ;;  %vm668_vm10 = vweird.f32 %v662_v32 }
 0x2cf   : > { %v675_v39 = vor.u32 1.1754944e-38, %v674_v35  ;;  %vm673_vm12 = vcmp.eq.f32.partialorder %v672_v37, 8.507059e+37 }
 0x2d3   : > { %v884_v50 = vpop.eup %883 }
 0x2d4   : > { %v664_v33 = vmul.f32 %v884_v50, %v662_v32  ;;  %vm669_vm9 = vweird.f32 %v884_v50 }
 0x2d5   : > { %vm670_vm11 = vmor %vm668_vm10, %vm669_vm9 }
 0x2d6   : > { %v665_v34 = vsub.f32 1.0, %v664_v33 }
 0x2d8   : > { %v666_v36 = vmul.f32 %v884_v50, %v665_v34 }
 0x2da   : > { %v667_v38 = vadd.f32 %v884_v50, %v666_v36 }
 0x2dc   : > { %v671_v40 = vsel %vm670_vm11, %v884_v50, %v667_v38 }
 0x2dd   : > { %v676_v41 = vsel %vm673_vm12, %v675_v39, %v671_v40 }
 0x2de   : > { %v678_v42 = vmul.f32 %v880_v30, %v676_v41  ;;  %v679_v43 = vmul.f32 %v882_v31, %v676_v41 }
 0x2e0   : > { %v680_v44 = vmul.f32 %v678_v42, %v1190_v2  ;;  %v681_v45 = vmul.f32 %v678_v42, %v1192_v3  ;;  %v682_v46 = vmul.f32 %v679_v43, %v1202_v9  ;;  %v683_v47 = vmul.f32 %v679_v43, %v1204_v10 }
 0x2e2   : > { %v684_v48 = vadd.f32 %v682_v46, %v680_v44  ;;  %v685_v49 = vadd.f32 %v683_v47, %v681_v45 }
 0x2e4   : > { %686 = vst [vmem:[%s309_s25] sm:$0xff] %v684_v48 }
 0x2e5   : > { %687 = vst [vmem:[%s309_s25 + $0x8] sm:$0xff] %v685_v49 }
 0x2e6   : > { %972 = shalt.err (!%p969_p0)
}
 0x2e7   : > { %823 = dma.vmem_to_hbm [thread:$0]  (%p1103_p11), %s703_s30, 256, %s705_s23, %s689_s0  }
 0x2e8 PF: > { %s716_s11 = sand.u32 1, %s1003_s21   ;;  %p1311_p1 = scmp.ge.s32.totalorder %s1015_s24, 2 }
 0x2e9   : > { %s717_s15 = scalar_lea.sflag [#allocation4], %s716_s11 }
 0x2ea   : > { %p833_p4 = pnand %p1311_p1, %p1107_p12 }
 0x2ec   : > { %p834_p7 = pneg %p833_p4 }
 0x2ee   : > { %998 = dma.done.wait (%p834_p7), %s717_s15, 256  }
 0x2ef   : > { %1000 = vsyncadd (%p834_p7), %s717_s15, 4294967040  ;;  %s1312_s18 = sld [smem:[#allocation11_spill]]  ;;  %p22_p5 = scmp.ge.s32.totalorder %s1078_s27, 4  }
 0x2f0   : > { %s1313_s23 = sld [smem:[#allocation12_spill]]  ;;  %s1314_s21 = smov %s1007_s22 }
 0x2f1   : > { %s1316_s24 = smov %s1078_s27  ;;  %24 = sbr.rel (!%p22_p5) target bundleno = 9 (0x9), region = 102 }
 0x2f5   : > { %s1315_s22 = smov %s1312_s18 }
 0x2f6   :  { %723 = vsyncpa [#allocation3], 1 }
 0x2f7   :  { %725 = vsyncpa [#allocation3 + $0x1], 1 }
 0x2f8   :  { %726 = vsyncpa [#allocation6], 1 }
 0x2f9   :  { %728 = vsyncpa [#allocation6 + $0x1], 1 }
 0x2fa   :  { %729 = vsyncpa [#allocation4], 1 }
 0x2fb   :  { %731 = vsyncpa [#allocation4 + $0x1], 1 }

</bundles_post_ra>
